<compile_context>
chip_gen: v7x
topology: tpu7x:2x2x1
jax: 0.10.0
libtpu: 0.0.40
codegen_flags: <defaults>
</compile_context>

<pallas_src>
import math

import jax
import jax.numpy as jnp
from jax.experimental import pallas as pl
from jax.experimental.pallas import tpu as pltpu

HEAD_OUT = 7      # [z_pres logit | z_where_loc (3) | z_where_scale raw (3)]
HEAD_PAD = 8      # packed lane width of the kernel output


def _sigmoid_exact(v):
    # exact sigmoid (review: do NOT use approx reciprocal on this path)
    return 1.0 / (1.0 + jnp.exp(-v))


def _softplus(v):
    # matches F.softplus(beta=1, threshold=20)
    return jnp.where(v > 20.0, v, jnp.log(1.0 + jnp.exp(jnp.minimum(v, 20.0))))


def predict_kernel(h_ref, w_ref, b_ref, out_ref):
    """One batch tile: z = h @ W + b, then per-lane head nonlinearity."""
    z = jnp.dot(h_ref[...], w_ref[...], preferred_element_type=jnp.float32)
    z = z + b_ref[...]
    lane = jax.lax.broadcasted_iota(jnp.int32, z.shape, 1)
    # lane 0 -> sigmoid, lanes 1..3 -> identity, lanes 4..7 -> softplus
    out = jnp.where(lane == 0, _sigmoid_exact(z),
                    jnp.where(lane < 4, z, _softplus(z)))
    out_ref[...] = out


def predict_forward(h, weight, bias, *, batch_tile=None):
    """Pallas implementation of Predict.forward.

    h:      (batch, lstm_hidden_size) float32
    weight: (7, lstm_hidden_size)     float32   (PyTorch nn.Linear layout)
    bias:   (7,)                      float32

    batch_tile: rows per grid iteration (multiple of 8).  Default: one
    full-batch tile.  For large batches use e.g. 128 (v5e) / 256 per core
    (v6e/v7x); >=2 grid iterations engage both v7x TensorCores.
    """
    batch, hidden = h.shape
    assert weight.shape == (HEAD_OUT, hidden) and bias.shape == (HEAD_OUT,)

    if batch_tile is None:
        bt = batch
    else:
        bt = batch_tile
        assert batch % bt == 0 and bt % 8 == 0, \
            "batch_tile must divide batch and be a multiple of 8"

    # Pack params once: (7, H) -> lane-dense (H, 8), (7,) -> (1, 8).
    w_p = jnp.zeros((hidden, HEAD_PAD), jnp.float32)
    w_p = w_p.at[:, :HEAD_OUT].set(weight.astype(jnp.float32).T)
    b_p = jnp.zeros((1, HEAD_PAD), jnp.float32)
    b_p = b_p.at[:, :HEAD_OUT].set(bias.astype(jnp.float32)[None, :])

    grid_spec = pltpu.PrefetchScalarGridSpec(
        num_scalar_prefetch=0,
        grid=(batch // bt,),
        in_specs=[
            pl.BlockSpec((bt, hidden), lambda i: (i, 0)),        # h tile
            pl.BlockSpec((hidden, HEAD_PAD), lambda i: (0, 0)),  # packed W
            pl.BlockSpec((1, HEAD_PAD), lambda i: (0, 0)),       # packed b
        ],
        out_specs=pl.BlockSpec((bt, HEAD_PAD), lambda i: (i, 0)),
    )

    packed = pl.pallas_call(
        predict_kernel,
        out_shape=jax.ShapeDtypeStruct((batch, HEAD_PAD), jnp.float32),
        grid_spec=grid_spec,
        compiler_params=pltpu.CompilerParams(
            dimension_semantics=("parallel",)),
    )(h.astype(jnp.float32), w_p, b_p)

    z_pres_p = packed[:, 0:1]
    z_where_loc = packed[:, 1:4]
    z_where_scale = packed[:, 4:7]
    return z_pres_p, z_where_loc, z_where_scale


if __name__ == "__main__":
    key = jax.random.PRNGKey(0)
    k_h, k_w, k_b = jax.random.split(key, 3)

    batch, hidden = 64, 32          # lstm_hidden_size = 32
    h = jax.random.normal(k_h, (batch, hidden), jnp.float32)
    bound = 1.0 / math.sqrt(hidden)  # PyTorch nn.Linear default init range
    weight = jax.random.uniform(k_w, (HEAD_OUT, hidden), jnp.float32,
                                -bound, bound)
    bias = jax.random.uniform(k_b, (HEAD_OUT,), jnp.float32, -bound, bound)

    fwd = jax.jit(predict_forward, static_argnames=("batch_tile",))
    z_pres_p, z_where_loc, z_where_scale = fwd(h, weight, bias, batch_tile=32)
    jax.block_until_ready((z_pres_p, z_where_loc, z_where_scale))

    # Pure-JAX reference (same semantics as the PyTorch module).
    z = jnp.dot(h, weight.T, precision=jax.lax.Precision.HIGHEST) + bias
    ref_pres = jax.nn.sigmoid(z[:, :1])
    ref_loc = z[:, 1:4]
    ref_scale = jax.nn.softplus(z[:, 4:])

    ok = (jnp.allclose(z_pres_p, ref_pres, atol=1e-3, rtol=1e-3)
          and jnp.allclose(z_where_loc, ref_loc, atol=1e-3, rtol=1e-3)
          and jnp.allclose(z_where_scale, ref_scale, atol=1e-3, rtol=1e-3))
    assert bool(ok), "Pallas Predict output mismatch vs JAX reference"
    print("KERNEL_OK")
</pallas_src>

<mosaic_0001>
module attributes {stable_mosaic.version = 11 : i64} {
  func.func @predict_kernel(%arg0: i32, %arg1: memref<32x32xf32, #tpu.memory_space<vmem>>, %arg2: memref<32x8xf32, #tpu.memory_space<vmem>>, %arg3: memref<1x8xf32, #tpu.memory_space<vmem>>, %arg4: memref<32x8xf32, #tpu.memory_space<vmem>>) attributes {dimension_semantics = [#tpu.dimension_semantics<parallel>], iteration_bounds = array<i64: 2>, scalar_prefetch = 0 : i64, scratch_operands = 0 : i64, tpu.core_type = #tpu.core_type<tc>, window_params = [{transform_indices = @transform_0, window_bounds = array<i64: 32, 32>}, {pipeline_mode = #tpu.pipeline_mode<synchronous>, transform_indices = @transform_1, window_bounds = array<i64: 32, 8>}, {pipeline_mode = #tpu.pipeline_mode<synchronous>, transform_indices = @transform_2, window_bounds = array<i64: 1, 8>}, {transform_indices = @transform_3, window_bounds = array<i64: 32, 8>}]} {
    %c0 = arith.constant 0 : index
    %c0_0 = arith.constant 0 : index
    %0 = vector.load %arg1[%c0, %c0_0] : memref<32x32xf32, #tpu.memory_space<vmem>>, vector<32x32xf32>
    %c0_1 = arith.constant 0 : index
    %c0_2 = arith.constant 0 : index
    %1 = vector.load %arg2[%c0_1, %c0_2] : memref<32x8xf32, #tpu.memory_space<vmem>>, vector<32x8xf32>
    %cst = arith.constant dense<0.000000e+00> : vector<32x8xf32>
    %2 = tpu.matmul %0, %1, %cst {dimension_numbers = #tpu.dot_dimension_numbers<[1], [0], [0], [1], [0, 0, 1, 1], [], []>} : vector<32x32xf32>, vector<32x8xf32>, vector<32x8xf32> -> vector<32x8xf32>
    %c0_3 = arith.constant 0 : index
    %c0_4 = arith.constant 0 : index
    %3 = vector.load %arg3[%c0_3, %c0_4] : memref<1x8xf32, #tpu.memory_space<vmem>>, vector<1x8xf32>
    %4 = vector.broadcast %3 : vector<1x8xf32> to vector<32x8xf32>
    %5 = arith.addf %2, %4 : vector<32x8xf32>
    %6 = tpu.iota {dimensions = array<i32: 1>} : vector<32x8xi32>
    %c0_i32 = arith.constant 0 : i32
    %7 = vector.broadcast %c0_i32 : i32 to vector<32x8xi32>
    %8 = arith.cmpi eq, %6, %7 : vector<32x8xi32>
    %cst_5 = arith.constant 0.000000e+00 : f32
    %9 = vector.broadcast %cst_5 : f32 to vector<32x8xf32>
    %10 = arith.subf %9, %5 : vector<32x8xf32>
    %11 = math.exp %10 : vector<32x8xf32>
    %cst_6 = arith.constant 1.000000e+00 : f32
    %12 = vector.broadcast %cst_6 : f32 to vector<32x8xf32>
    %13 = arith.addf %12, %11 : vector<32x8xf32>
    %cst_7 = arith.constant 1.000000e+00 : f32
    %14 = vector.broadcast %cst_7 : f32 to vector<32x8xf32>
    %15 = arith.divf %14, %13 : vector<32x8xf32>
    %c4_i32 = arith.constant 4 : i32
    %16 = vector.broadcast %c4_i32 : i32 to vector<32x8xi32>
    %17 = arith.cmpi slt, %6, %16 : vector<32x8xi32>
    %cst_8 = arith.constant 2.000000e+01 : f32
    %18 = vector.broadcast %cst_8 : f32 to vector<32x8xf32>
    %19 = arith.cmpf ogt, %5, %18 : vector<32x8xf32>
    %cst_9 = arith.constant 2.000000e+01 : f32
    %20 = vector.broadcast %cst_9 : f32 to vector<32x8xf32>
    %21 = arith.minimumf %5, %20 : vector<32x8xf32>
    %22 = math.exp %21 : vector<32x8xf32>
    %cst_10 = arith.constant 1.000000e+00 : f32
    %23 = vector.broadcast %cst_10 : f32 to vector<32x8xf32>
    %24 = arith.addf %23, %22 : vector<32x8xf32>
    %25 = math.log %24 : vector<32x8xf32>
    %26 = arith.select %19, %5, %25 : vector<32x8xi1>, vector<32x8xf32>
    %27 = arith.select %17, %5, %26 : vector<32x8xi1>, vector<32x8xf32>
    %28 = arith.select %8, %15, %27 : vector<32x8xi1>, vector<32x8xf32>
    %c0_11 = arith.constant 0 : index
    %c0_12 = arith.constant 0 : index
    %29 = vector.load %arg4[%c0_11, %c0_12] : memref<32x8xf32, #tpu.memory_space<vmem>>, vector<32x8xf32>
    tpu.vector_store %arg4[%c0_11, %c0_12], %28 {strides = array<i32>} : memref<32x8xf32, #tpu.memory_space<vmem>>, vector<32x8xf32>,
    return
  }
  func.func @transform_0(%arg0: i32) -> (i32, i32) {
    %c0_i32 = arith.constant 0 : i32
    %c0_i32_0 = arith.constant 0 : i32
    return %arg0, %c0_i32 : i32, i32
  }
  func.func @transform_1(%arg0: i32) -> (i32, i32) {
    %c0_i32 = arith.constant 0 : i32
    %c0_i32_0 = arith.constant 0 : i32
    %c0_i32_1 = arith.constant 0 : i32
    return %c0_i32, %c0_i32_0 : i32, i32
  }
  func.func @transform_2(%arg0: i32) -> (i32, i32) {
    %c0_i32 = arith.constant 0 : i32
    %c0_i32_0 = arith.constant 0 : i32
    %c0_i32_1 = arith.constant 0 : i32
    return %c0_i32, %c0_i32_0 : i32, i32
  }
  func.func @transform_3(%arg0: i32) -> (i32, i32) {
    %c0_i32 = arith.constant 0 : i32
    %c0_i32_0 = arith.constant 0 : i32
    return %arg0, %c0_i32 : i32, i32
  }
}

</mosaic_0001>

<bundles_post_ra>
// kernel: predict_forward.1
= control target key start
LH: loop header
LB: loop body
LE: loop exit
PB: predicated region body
PF: predicated region fallthrough
CT: control target
= control target key end

     0   :  { %s534_s12 = smov 0   ;;  %s613_s0 = inlined_call_operand.vmem [shape: f32[64,32], index: 0, kind: input, shape index: {}]   ;;  %s614_s1 = inlined_call_operand.vmem [shape: f32[32,8], index: 1, kind: input, shape index: {}]   ;;  %s615_s2 = inlined_call_operand.vmem [shape: f32[1,8], index: 2, kind: input, shape index: {}]   ;;  %s616_s3 = inlined_call_operand.vmem [shape: f32[64,8], index: 3, kind: output, shape index: {}]  }
   0x1 LB: > { %s416_s13 = sadd.s32 4294967295, %s512_s12   ;;  %p420_p0 = scmp.ge.s32.totalorder %s512_s12, 1  ;;  %s512_s12 = sphi %s534_s12, %s13_s12  }
   0x2   : > { %p138_p1 = scmp.lt.s32.totalorder %s512_s12, 3 }
   0x4   : > { %p139_p2 = pnand %p420_p0, %p138_p1 }
   0x5   : > { %v178_v0 = vld [vmem:[%s614_s1] sm:$0xff] (!%p139_p2)  ;;  %v179_v1 = vld [vmem:[%s614_s1 + $0x8] sm:$0xff] (!%p139_p2)  ;;  %v180_v2 = vld [vmem:[%s614_s1 + $0x10] sm:$0xff] (!%p139_p2)  ;;  %s421_s20 = sshll.u32 (!%p139_p2), %s416_s13, 2  ;;  %vm189_vm0 = vcmask (!%p139_p2), 261120   ;;  %v287_v49 = vlaneseq (!%p139_p2)  ;;  %vm355_vm6 = vcmask (!%p139_p2), 64512  }
   0x6   : > { %142 = sbr.rel (%p139_p2) target bundleno = 272 (0x110), region = 32  ;;  %v454_v3 = vpack.c.bf16 (!%p139_p2), %v179_v1, %v178_v0  ;;  %v181_v4 = vld [vmem:[%s614_s1 + $0x18] sm:$0xff] (!%p139_p2)  ;;  %p163_p3 = scmp.lt.s32.totalorder (!%p139_p2), %s421_s20, 7  ;;  %v425_v10 = vld [vmem:[%s615_s2] ss:$0 sm:$0xff] (!%p139_p2) }
   0x7   : > { %v458_v5 = vpack.c.bf16 (!%p139_p2), %v181_v4, %v180_v2  ;;  %v288_v53 = vand.u32 (!%p139_p2), 127, %v287_v49 }
   0x8   : > { %455 = vmatprep.subr.bf16.mxu0 (!%p139_p2), %v454_v3  ;;  %462 = vmatprep.subr.bf16.mxu1 (!%p139_p2), %v454_v3 }
   0x9   : > { %457 = vmatpush3.bf16.msra.mxu0 (!%p139_p2), %v454_v3  ;;  %464 = vmatpush3.bf16.msra.mxu1 (!%p139_p2), %v454_v3  ;;  %vm314_vm2 = vcmp.lt.s32.totalorder (!%p139_p2), %v288_v53, 4  ;;  %vm289_vm4 = vcmp.eq.s32.totalorder (!%p139_p2), %v288_v53, 0 }
   0xa   : > { %459 = vmatprep.subr.bf16.mxu0 (!%p139_p2), %v458_v5  ;;  %463 = vmatprep.subr.bf16.mxu1 (!%p139_p2), %v458_v5 }
   0xd   : > { %s618_s20 = smov (!%p163_p3, %s421_s20), 7  ;;  %461 = vmatpush3.bf16.msra.mxu0 %v458_v5  ;;  %465 = vmatpush3.bf16.msra.mxu1 %v458_v5 }
   0xe   : > { %s422_s23 = sshll.u32 %s618_s20, 3 }
   0xf   : > { %s166_s26 = scalar_lea.vmem %s613_s0, %s422_s23  ;;  %s172_s4 = scalar_lea.vmem %s616_s3, %s422_s23 }
  0x10   : > { %v174_v6 = vld [vmem:[%s166_s26] sm:$0xff]  ;;  %v176_v7 = vld [vmem:[%s166_s26 + $0x10] sm:$0xff]  ;;  %v175_v8 = vld [vmem:[%s166_s26 + $0x8] sm:$0xff] }
  0x11   : > { %v177_v9 = vld [vmem:[%s166_s26 + $0x18] sm:$0xff]  ;;  %448 = vmatprep.mubr.msk.f32.mxu0 %vm189_vm0, %v174_v6  ;;  %451 = vmatprep.mubr.msk.f32.mxu1 %vm189_vm0, %v176_v7 }
  0x12   : > { %449 = vmatmul.mubr.msk.f32.vlgmr.msra.gmra.mrb[0].mxu0 %vm189_vm0, %v175_v8  ;;  %452 = vmatmul.mubr.msk.f32.vlgmr.msra.gmra.mrb[0].mxu1 %vm189_vm0, %v177_v9 }
  0xe5   : > { %v450_v11 = vpop.f32.mrb[0].mxu0  ;;  %v453_v12 = vpop.f32.mrb[0].mxu1 }
  0xe6   : > { %v565_v13 = vadd.f32 %v450_v11, %v425_v10  ;;  %v567_v14 = vadd.f32 %v453_v12, %v425_v10  ;;  %v268_v15 = vpop.f32.mrb[1].mxu0  ;;  %v278_v16 = vpop.f32.mrb[1].mxu1 }
  0xe7   : > { %v569_v17 = vadd.f32 %v425_v10, %v268_v15  ;;  %v571_v18 = vadd.f32 %v425_v10, %v278_v16 }
  0xe8   : > { %v291_v19 = vsub.f32 0.0, %v565_v13  ;;  %v320_v20 = vmin.f32 %v565_v13, 20.0  ;;  %v322_v21 = vmin.f32 %v567_v14, 20.0  ;;  %v293_v28 = vsub.f32 0.0, %v567_v14 }
  0xe9   : > { %v290_v22 = vsub.f32 0.0, %v569_v17  ;;  %v319_v26 = vmin.f32 %v569_v17, 20.0  ;;  %v292_v27 = vsub.f32 0.0, %v571_v18  ;;  %v321_v30 = vmin.f32 %v571_v18, 20.0 }
  0xea   : > { %v296_v23 = vmul.f32 1.442695, %v291_v19  ;;  %v325_v24 = vmul.f32 1.442695, %v320_v20  ;;  %v329_v25 = vmul.f32 1.442695, %v322_v21 }
  0xeb   : > { %v294_v29 = vmul.f32 1.442695, %v290_v22  ;;  %v323_v31 = vmul.f32 1.442695, %v319_v26  ;;  %v298_v32 = vmul.f32 1.442695, %v292_v27 }
  0xec   : > { %474 = vpow2.f32 %v325_v24  ;;  %v327_v33 = vmul.f32 1.442695, %v321_v30  ;;  %v300_v34 = vmul.f32 1.442695, %v293_v28  ;;  %vm316_vm1 = vcmp.gt.f32.partialorder %v565_v13, 20.0 }
  0xed   : > { %476 = vpow2.f32 %v296_v23  ;;  %vm318_vm3 = vcmp.gt.f32.partialorder %v567_v14, 20.0  ;;  %vm315_vm5 = vcmp.gt.f32.partialorder %v569_v17, 20.0  ;;  %vm317_vm7 = vcmp.gt.f32.partialorder %v571_v18, 20.0 }
  0xee   : > { %478 = vpow2.f32 %v329_v25 }
  0xef   : > { %480 = vpow2.f32 %v294_v29 }
  0xf0   : > { %482 = vpow2.f32 %v323_v31 }
  0xf1   : > { %484 = vpow2.f32 %v298_v32 }
  0xf2   : > { %486 = vpow2.f32 %v327_v33 }
  0xf3   : > { %488 = vpow2.f32 %v300_v34 }
  0xf6   : > { %v475_v35 = vpop.eup %474 }
  0xf7   : > { %v477_v36 = vpop.eup %476  ;;  %v332_v37 = vadd.f32 1.0, %v475_v35 }
  0xf8   : > { %v479_v38 = vpop.eup %478  ;;  %v303_v48 = vadd.f32 1.0, %v477_v36 }
  0xf9   : > { %v481_v39 = vpop.eup %480  ;;  %490 = vlog2.f32 %v332_v37  ;;  %v334_v40 = vadd.f32 1.0, %v479_v38 }
  0xfa   : > { %v483_v41 = vpop.eup %482  ;;  %v302_v46 = vadd.f32 1.0, %v481_v39 }
  0xfb   : > { %v485_v42 = vpop.eup %484  ;;  %492 = vlog2.f32 %v334_v40  ;;  %v331_v43 = vadd.f32 1.0, %v483_v41 }
  0xfc   : > { %v487_v44 = vpop.eup %486  ;;  %v304_v50 = vadd.f32 1.0, %v485_v42 }
  0xfd   : > { %v489_v45 = vpop.eup %488  ;;  %494 = vlog2.f32 %v331_v43  ;;  %v333_v47 = vadd.f32 1.0, %v487_v44 }
  0xfe   : > { %v305_v51 = vadd.f32 1.0, %v489_v45 }
  0xff   : > { %496 = vlog2.f32 %v333_v47 }
 0x100   : > { %498 = vrcp.f32 %v302_v46 }
 0x101   : > { %500 = vrcp.f32 %v303_v48 }
 0x102   : > { %502 = vrcp.f32 %v304_v50 }
 0x103   : > { %v491_v52 = vpop.eup %490  ;;  %504 = vrcp.f32 %v305_v51 }
 0x104   : > { %v338_v54 = vmul.f32 0.6931472, %v491_v52 }
 0x105   : > { %v493_v55 = vpop.eup %492 }
 0x106   : > { %v342_v56 = vmul.f32 0.6931472, %v493_v55  ;;  %v344_v58 = vsel %vm316_vm1, %v565_v13, %v338_v54 }
 0x107   : > { %v495_v57 = vpop.eup %494  ;;  %v348_v62 = vsel %vm314_vm2, %v565_v13, %v344_v58 }
 0x108   : > { %v336_v59 = vmul.f32 0.6931472, %v495_v57  ;;  %v346_v61 = vsel %vm318_vm3, %v567_v14, %v342_v56 }
 0x109   : > { %v497_v60 = vpop.eup %496  ;;  %v350_v4 = vsel %vm314_vm2, %v567_v14, %v346_v61 }
 0x10a   : > { %v343_v63 = vsel %vm315_vm5, %v569_v17, %v336_v59  ;;  %v340_v0 = vmul.f32 0.6931472, %v497_v60  ;;  %v499_v1 = vpop.eup %498 }
 0x10b   : > { %v347_v2 = vsel %vm314_vm2, %v569_v17, %v343_v63  ;;  %v501_v3 = vpop.eup %500 }
 0x10c   : > { %v351_v5 = vsel %vm289_vm4, %v499_v1, %v347_v2  ;;  %v345_v6 = vsel %vm317_vm7, %v571_v18, %v340_v0  ;;  %v503_v7 = vpop.eup %502  ;;  %v352_v8 = vsel %vm289_vm4, %v501_v3, %v348_v62 }
 0x10d   : > { %356 = vst.msk [vmem:[%s172_s4] sm:$0xff] %vm355_vm6, %v351_v5  ;;  %v349_v9 = vsel %vm314_vm2, %v571_v18, %v345_v6  ;;  %v505_v10 = vpop.eup %504  ;;  %357 = vst.msk [vmem:[%s172_s4 + $0x8] sm:$0xff] %vm355_vm6, %v352_v8 }
 0x10e   : > { %v353_v11 = vsel %vm289_vm4, %v503_v7, %v349_v9  ;;  %v354_v12 = vsel %vm289_vm4, %v505_v10, %v350_v4 }
 0x10f   : > { %358 = vst.msk [vmem:[%s172_s4 + $0x10] sm:$0xff] %vm355_vm6, %v353_v11  ;;  %359 = vst.msk [vmem:[%s172_s4 + $0x18] sm:$0xff] %vm355_vm6, %v354_v12 }
 0x110 PF: > { %s13_s12 = sadd.s32 1, %s512_s12  }
 0x111   : > { %p10_p4 = scmp.ge.s32.totalorder %s13_s12, 4  }
 0x113   :  { %12 = sbr.rel (!%p10_p4) target bundleno = 1 (0x1), region = 62 }

</bundles_post_ra>
